<compile_context>
chip_gen: v6e
topology: v6e:2x2x1
jax: 0.10.0
libtpu: 0.0.40
codegen_flags: <defaults>
</compile_context>

<pallas_src>
import functools

import jax
import jax.numpy as jnp
from jax.experimental import pallas as pl
from jax.experimental.pallas import tpu as pltpu


def _dice_partial_kernel(pred_ref, gt_ref, inter_ref, psm_ref, pg_ref, *,
                         class_ids, n_s_inner, r8, first_pad_tile, needs_mask):
    # pred_ref : (1, C, TILE_R, 128) logits of the *selected* classes (native dtype)
    # gt_ref   : (1, 1, TILE_R, 128) int32 labels (-1 on spatial padding)
    # outputs  : (1, 1, C, 8, 128) f32 resident accumulators
    C = len(class_ids)

    @pl.when(pl.program_id(2) == 0)
    def _init():
        inter_ref[...] = jnp.zeros_like(inter_ref)
        psm_ref[...] = jnp.zeros_like(psm_ref)
        pg_ref[...] = jnp.zeros_like(pg_ref)

    # Exact-divisor unroll: no scan remainder handling, some ILP across chunks.
    unroll = 4 if r8 % 4 == 0 else (2 if r8 % 2 == 0 else 1)

    def _run(apply_mask):
        # Walk the tile in 8-row chunks: only ~2C+4 working vregs plus the
        # 3C (8,128) accumulator carries are live at any time -> no spills.
        def chunk(i, carry):
            r0 = pl.multiple_of(i * 8, 8)
            labels = gt_ref[0, 0, pl.ds(r0, 8), :]                # (8,128) i32
            logits = [pred_ref[0, c, pl.ds(r0, 8), :].astype(jnp.float32)
                      for c in range(C)]
            # Numerically-stable softmax over the selected classes (VPU + EUP).
            m = logits[0]
            for lc in logits[1:]:
                m = jnp.maximum(m, lc)
            exps = [jnp.exp(lc - m) for lc in logits]
            z = exps[0]
            for ec in exps[1:]:
                z = z + ec
            inv_z = pl.reciprocal(z, approx=True)                 # EUP vrcp
            if apply_mask:
                pad = labels < 0                                  # spatial padding
            new_i, new_s, new_g = [], [], []
            for c, cid in enumerate(class_ids):
                sm_c = exps[c] * inv_z
                hit = labels == cid          # one-hot; -1 padding never matches
                new_i.append(carry[c] + jnp.where(hit, sm_c, 0.0))
                if apply_mask:
                    new_s.append(carry[C + c] + jnp.where(pad, 0.0, sm_c))
                else:
                    new_s.append(carry[C + c] + sm_c)
                new_g.append(carry[2 * C + c] + hit.astype(jnp.float32))
            return tuple(new_i) + tuple(new_s) + tuple(new_g)

        zero = jnp.zeros((8, 128), jnp.float32)
        carry = jax.lax.fori_loop(0, r8, chunk, (zero,) * (3 * C),
                                  unroll=unroll)
        # Single += per output ref per grid step.
        for c in range(C):
            inter_ref[0, 0, c] += carry[c]
            psm_ref[0, 0, c] += carry[C + c]
            pg_ref[0, 0, c] += carry[2 * C + c]

    if not needs_mask:
        _run(False)
    elif first_pad_tile == 0:
        _run(True)
    else:
        gidx = pl.program_id(1) * n_s_inner + pl.program_id(2)
        has_pad = gidx >= first_pad_tile

        @pl.when(has_pad)
        def _masked():
            _run(True)

        @pl.when(jnp.logical_not(has_pad))
        def _fast():
            _run(False)


def _pick_tile_s(n_channels, s, pred_itemsize, cap=None):
    """Spatial tile size in pixels (multiple of 1024).

    Keeps the double-buffered input streams (selected-channel pred + int32
    labels) under ~8 MiB total — fits v5e's 16 MiB default scoped VMEM and
    v6e/v7x defaults with no vmem_limit override — while allowing up to
    131072 px (tile_r = 1024) to amortize the ~0.35 us per-grid-step overhead.
    """
    bytes_per_px = n_channels * pred_itemsize + 4          # pred + int32 labels
    t = (8 * 1024 * 1024) // (2 * bytes_per_px)
    t = (t // 1024) * 1024
    t = max(1024, min(131072, t))
    if cap is not None:
        t = max(1024, min(t, (cap // 1024) * 1024))
    t = min(t, -(-s // 1024) * 1024)
    return t


def custom_soft_dice_loss(pred, target, *, n_classes, class_ids, smooth=1.0,
                          max_tile_px=None):
    """JAX/Pallas equivalent of CustomSoftDiceLoss.forward.

    pred:   (B, n_classes, H, W) logits (f32 or bf16 — streamed as-is; pass
            bf16 to halve HBM traffic on bandwidth-bound v5e/v6e).
    target: (B, H, W) integer labels.
    """
    assert n_classes > 1  # TODO(synk): One_Hot depth<=1 special case not implemented.
    class_ids = tuple(int(c) for c in class_ids)
    assert len(class_ids) >= 1
    B, C_in, H, W = pred.shape
    assert C_in == n_classes
    C = len(class_ids)
    S = H * W

    # Select channels in the wrapper so unused classes never hit HBM->VMEM.
    if class_ids == tuple(range(C_in)):
        pred_sel = pred
    else:
        lo, hi = min(class_ids), max(class_ids)
        if class_ids == tuple(range(lo, hi + 1)):
            pred_sel = pred[:, lo:hi + 1]                  # contiguous: cheap slice
        else:
            pred_sel = pred[:, list(class_ids)]            # one-off gather in XLA

    tile_s = _pick_tile_s(C, S, jnp.dtype(pred.dtype).itemsize, cap=max_tile_px)
    tile_r = tile_s // 128
    r8 = tile_r // 8
    n_tiles = -(-S // tile_s)
    # Megacore: split the spatial axis into two "parallel" chunks for odd
    # batch sizes (incl. B == 1) so both TensorCores are used on v7x.
    n_par = 2 if (B % 2 == 1 and n_tiles >= 2) else 1
    n_s = -(-n_tiles // n_par)
    s_pad = n_par * n_s * tile_s
    first_pad_tile = S // tile_s
    needs_mask = (s_pad != S)

    pred_flat = pred_sel.reshape(B, C, S)                  # no dtype upcast
    gt_flat = target.reshape(B, 1, S).astype(jnp.int32)
    if needs_mask:
        pad_n = s_pad - S
        pred_flat = jnp.pad(pred_flat, ((0, 0), (0, 0), (0, pad_n)))
        gt_flat = jnp.pad(gt_flat, ((0, 0), (0, 0), (0, pad_n)),
                          constant_values=-1)
    pred_r = pred_flat.reshape(B, C, s_pad // 128, 128)
    gt_r = gt_flat.reshape(B, 1, s_pad // 128, 128)

    kernel = functools.partial(
        _dice_partial_kernel, class_ids=class_ids, n_s_inner=n_s, r8=r8,
        first_pad_tile=first_pad_tile, needs_mask=needs_mask)

    acc_shape = jax.ShapeDtypeStruct((B, n_par, C, 8, 128), jnp.float32)
    acc_spec = pl.BlockSpec((1, 1, C, 8, 128), lambda b, p, s: (b, p, 0, 0, 0))
    pred_spec = pl.BlockSpec((1, C, tile_r, 128),
                             lambda b, p, s: (b, 0, p * n_s + s, 0))
    gt_spec = pl.BlockSpec((1, 1, tile_r, 128),
                           lambda b, p, s: (b, 0, p * n_s + s, 0))

    bytes_accessed = int(pred_r.size * jnp.dtype(pred_r.dtype).itemsize
                         + gt_r.size * 4 + 3 * B * n_par * C * 8 * 128 * 4)
    cost = pl.CostEstimate(
        flops=int(B * s_pad * (10 * C + 4)),
        transcendentals=int(B * s_pad * (C + 1)),
        bytes_accessed=bytes_accessed)

    inter_p, psm_p, pg_p = pl.pallas_call(
        kernel,
        out_shape=(acc_shape, acc_shape, acc_shape),
        grid_spec=pltpu.PrefetchScalarGridSpec(
            num_scalar_prefetch=0,
            grid=(B, n_par, n_s),
            in_specs=[pred_spec, gt_spec],
            out_specs=[acc_spec, acc_spec, acc_spec],
        ),
        compiler_params=pltpu.CompilerParams(
            dimension_semantics=("parallel", "parallel", "arbitrary")),
        cost_estimate=cost,
    )(pred_r, gt_r)

    # Tiny epilogue in plain JAX — mirrors the PyTorch reference exactly.
    inter = inter_p.sum(axis=(1, 3, 4)) + smooth           # (B, C)
    union = psm_p.sum(axis=(1, 3, 4)) + pg_p.sum(axis=(1, 3, 4)) + smooth
    score = jnp.sum(2.0 * inter / union)
    return 1.0 - score / (float(B) * float(n_classes))


def _reference_loss(pred, target, n_classes, class_ids, smooth):
    """Pure-JAX transcription of CustomSoftDiceLoss.forward (for checking)."""
    B = pred.shape[0]
    ids = jnp.asarray(class_ids)
    x = jax.nn.softmax(pred[:, ids].astype(jnp.float32), axis=1)
    x = x.reshape(B, len(class_ids), -1)
    t = jax.nn.one_hot(target, n_classes, dtype=jnp.float32)
    t = jnp.moveaxis(t, -1, 1).reshape(B, n_classes, -1)[:, ids, :]
    inter = jnp.sum(x * t, axis=2) + smooth
    union = jnp.sum(x, axis=2) + jnp.sum(t, axis=2) + smooth
    score = jnp.sum(2.0 * inter / union)
    return 1.0 - score / (float(B) * float(n_classes))


if __name__ == "__main__":
    root = jax.random.PRNGKey(0)

    def _check(tag, B, H, W, n_classes, class_ids, max_tile_px=None):
        k1, k2 = jax.random.split(jax.random.fold_in(root, hash(tag) % 1000))
        pred = jax.random.normal(k1, (B, n_classes, H, W), dtype=jnp.float32)
        gt = jax.random.randint(k2, (B, H, W), 0, n_classes, dtype=jnp.int32)
        loss = jax.block_until_ready(
            custom_soft_dice_loss(pred, gt, n_classes=n_classes,
                                  class_ids=class_ids, smooth=1.0,
                                  max_tile_px=max_tile_px))
        ref = jax.block_until_ready(
            _reference_loss(pred, gt, n_classes, class_ids, 1.0))
        assert abs(float(loss) - float(ref)) < 1e-3, (tag, float(loss), float(ref))

    # Primary small case (all classes selected, single tile, masked path).
    _check("base", B=2, H=16, W=16, n_classes=4, class_ids=(0, 1, 2, 3))
    # Channel subset (exercises wrapper-side class slicing).
    _check("subset", B=2, H=16, W=16, n_classes=4, class_ids=(1, 2))
    # Multi-tile spatial reduction + unmasked/masked dual path (forced small tile).
    _check("multitile", B=2, H=40, W=40, n_classes=4, class_ids=(0, 1, 2, 3),
           max_tile_px=1024)
    # Odd batch -> spatial megacore split (n_par = 2) + epilogue chunk sum.
    _check("megacore", B=1, H=40, W=40, n_classes=4, class_ids=(0, 1, 2, 3),
           max_tile_px=1024)

    print("KERNEL_OK")
</pallas_src>

<mosaic_0001>
module attributes {stable_mosaic.version = 11 : i64} {
  func.func @_dice_partial_kernel(%arg0: i32, %arg1: i32, %arg2: i32, %arg3: memref<1x4x8x128xf32, #tpu.memory_space<vmem>>, %arg4: memref<1x1x8x128xi32, #tpu.memory_space<vmem>>, %arg5: memref<1x1x4x8x128xf32, #tpu.memory_space<vmem>>, %arg6: memref<1x1x4x8x128xf32, #tpu.memory_space<vmem>>, %arg7: memref<1x1x4x8x128xf32, #tpu.memory_space<vmem>>) attributes {dimension_semantics = [#tpu.dimension_semantics<parallel>, #tpu.dimension_semantics<parallel>, #tpu.dimension_semantics<arbitrary>], iteration_bounds = array<i64: 2, 1, 1>, scalar_prefetch = 0 : i64, scratch_operands = 0 : i64, tpu.core_type = #tpu.core_type<tc>, window_params = [{transform_indices = @transform_0, window_bounds = array<i64: 1, 4, 8, 128>}, {transform_indices = @transform_1, window_bounds = array<i64: 1, 1, 8, 128>}, {transform_indices = @transform_2, window_bounds = array<i64: 1, 1, 4, 8, 128>}, {transform_indices = @transform_3, window_bounds = array<i64: 1, 1, 4, 8, 128>}, {transform_indices = @transform_4, window_bounds = array<i64: 1, 1, 4, 8, 128>}]} {
    %c0_i32 = arith.constant 0 : i32
    %0 = arith.cmpi eq, %arg2, %c0_i32 : i32
    %1 = arith.extui %0 : i1 to i32
    %c0_i32_0 = arith.constant 0 : i32
    %2 = arith.cmpi ne, %1, %c0_i32_0 : i32
    scf.if %2 {
      %cst_144 = arith.constant 0.000000e+00 : f32
      %158 = vector.broadcast %cst_144 : f32 to vector<1x1x4x8x128xf32>
      %c0_145 = arith.constant 0 : index
      %c0_146 = arith.constant 0 : index
      %c0_147 = arith.constant 0 : index
      %c0_148 = arith.constant 0 : index
      %c0_149 = arith.constant 0 : index
      %159 = vector.load %arg5[%c0_145, %c0_146, %c0_147, %c0_148, %c0_149] : memref<1x1x4x8x128xf32, #tpu.memory_space<vmem>>, vector<1x1x4x8x128xf32>
      tpu.vector_store %arg5[%c0_145, %c0_146, %c0_147, %c0_148, %c0_149], %158 {strides = array<i32>} : memref<1x1x4x8x128xf32, #tpu.memory_space<vmem>>, vector<1x1x4x8x128xf32>,
      %cst_150 = arith.constant 0.000000e+00 : f32
      %160 = vector.broadcast %cst_150 : f32 to vector<1x1x4x8x128xf32>
      %c0_151 = arith.constant 0 : index
      %c0_152 = arith.constant 0 : index
      %c0_153 = arith.constant 0 : index
      %c0_154 = arith.constant 0 : index
      %c0_155 = arith.constant 0 : index
      %161 = vector.load %arg6[%c0_151, %c0_152, %c0_153, %c0_154, %c0_155] : memref<1x1x4x8x128xf32, #tpu.memory_space<vmem>>, vector<1x1x4x8x128xf32>
      tpu.vector_store %arg6[%c0_151, %c0_152, %c0_153, %c0_154, %c0_155], %160 {strides = array<i32>} : memref<1x1x4x8x128xf32, #tpu.memory_space<vmem>>, vector<1x1x4x8x128xf32>,
      %cst_156 = arith.constant 0.000000e+00 : f32
      %162 = vector.broadcast %cst_156 : f32 to vector<1x1x4x8x128xf32>
      %c0_157 = arith.constant 0 : index
      %c0_158 = arith.constant 0 : index
      %c0_159 = arith.constant 0 : index
      %c0_160 = arith.constant 0 : index
      %c0_161 = arith.constant 0 : index
      %163 = vector.load %arg7[%c0_157, %c0_158, %c0_159, %c0_160, %c0_161] : memref<1x1x4x8x128xf32, #tpu.memory_space<vmem>>, vector<1x1x4x8x128xf32>
      tpu.vector_store %arg7[%c0_157, %c0_158, %c0_159, %c0_160, %c0_161], %162 {strides = array<i32>} : memref<1x1x4x8x128xf32, #tpu.memory_space<vmem>>, vector<1x1x4x8x128xf32>,
    } else {
    }
    %cst = arith.constant 0.000000e+00 : f32
    %3 = vector.broadcast %cst : f32 to vector<8x128xf32>
    %c0_i32_1 = arith.constant 0 : i32
    %c8_i32 = arith.constant 8 : i32
    %4 = arith.muli %c0_i32_1, %c8_i32 : i32
    %5 = tpu.assume_multiple %4, 8 : i32
    %c0 = arith.constant 0 : index
    %c0_2 = arith.constant 0 : index
    %6 = arith.index_cast %5 : i32 to index
    %c0_3 = arith.constant 0 : index
    %7 = vector.load %arg4[%c0, %c0_2, %6, %c0_3] : memref<1x1x8x128xi32, #tpu.memory_space<vmem>>, vector<1x1x8x128xi32>
    %8 = vector.shape_cast %7 : vector<1x1x8x128xi32> to vector<8x128xi32>
    %c0_4 = arith.constant 0 : index
    %c0_5 = arith.constant 0 : index
    %9 = arith.index_cast %5 : i32 to index
    %c0_6 = arith.constant 0 : index
    %10 = vector.load %arg3[%c0_4, %c0_5, %9, %c0_6] : memref<1x4x8x128xf32, #tpu.memory_space<vmem>>, vector<1x1x8x128xf32>
    %11 = vector.shape_cast %10 : vector<1x1x8x128xf32> to vector<8x128xf32>
    %c0_7 = arith.constant 0 : index
    %c1 = arith.constant 1 : index
    %12 = arith.index_cast %5 : i32 to index
    %c0_8 = arith.constant 0 : index
    %13 = vector.load %arg3[%c0_7, %c1, %12, %c0_8] : memref<1x4x8x128xf32, #tpu.memory_space<vmem>>, vector<1x1x8x128xf32>
    %14 = vector.shape_cast %13 : vector<1x1x8x128xf32> to vector<8x128xf32>
    %c0_9 = arith.constant 0 : index
    %c2 = arith.constant 2 : index
    %15 = arith.index_cast %5 : i32 to index
    %c0_10 = arith.constant 0 : index
    %16 = vector.load %arg3[%c0_9, %c2, %15, %c0_10] : memref<1x4x8x128xf32, #tpu.memory_space<vmem>>, vector<1x1x8x128xf32>
    %17 = vector.shape_cast %16 : vector<1x1x8x128xf32> to vector<8x128xf32>
    %c0_11 = arith.constant 0 : index
    %c3 = arith.constant 3 : index
    %18 = arith.index_cast %5 : i32 to index
    %c0_12 = arith.constant 0 : index
    %19 = vector.load %arg3[%c0_11, %c3, %18, %c0_12] : memref<1x4x8x128xf32, #tpu.memory_space<vmem>>, vector<1x1x8x128xf32>
    %20 = vector.shape_cast %19 : vector<1x1x8x128xf32> to vector<8x128xf32>
    %21 = arith.maximumf %11, %14 : vector<8x128xf32>
    %22 = arith.maximumf %21, %17 : vector<8x128xf32>
    %23 = arith.maximumf %22, %20 : vector<8x128xf32>
    %24 = arith.subf %11, %23 : vector<8x128xf32>
    %25 = math.exp %24 : vector<8x128xf32>
    %26 = arith.subf %14, %23 : vector<8x128xf32>
    %27 = math.exp %26 : vector<8x128xf32>
    %28 = arith.subf %17, %23 : vector<8x128xf32>
    %29 = math.exp %28 : vector<8x128xf32>
    %30 = arith.subf %20, %23 : vector<8x128xf32>
    %31 = math.exp %30 : vector<8x128xf32>
    %32 = arith.addf %25, %27 : vector<8x128xf32>
    %33 = arith.addf %32, %29 : vector<8x128xf32>
    %34 = arith.addf %33, %31 : vector<8x128xf32>
    %35 = tpu.reciprocal %34 {approx = true} : vector<8x128xf32> -> vector<8x128xf32>
    %c0_i32_13 = arith.constant 0 : i32
    %36 = vector.broadcast %c0_i32_13 : i32 to vector<8x128xi32>
    %37 = arith.cmpi slt, %8, %36 : vector<8x128xi32>
    %38 = arith.mulf %25, %35 : vector<8x128xf32>
    %c0_i32_14 = arith.constant 0 : i32
    %39 = vector.broadcast %c0_i32_14 : i32 to vector<8x128xi32>
    %40 = arith.cmpi eq, %8, %39 : vector<8x128xi32>
    %cst_15 = arith.constant 0.000000e+00 : f32
    %41 = vector.broadcast %cst_15 : f32 to vector<8x128xf32>
    %42 = arith.select %40, %38, %41 : vector<8x128xi1>, vector<8x128xf32>
    %43 = arith.addf %3, %42 : vector<8x128xf32>
    %cst_16 = arith.constant 0.000000e+00 : f32
    %44 = vector.broadcast %cst_16 : f32 to vector<8x128xf32>
    %45 = arith.select %37, %44, %38 : vector<8x128xi1>, vector<8x128xf32>
    %46 = arith.addf %3, %45 : vector<8x128xf32>
    %47 = arith.extui %40 : vector<8x128xi1> to vector<8x128xi32>
    %48 = arith.sitofp %47 : vector<8x128xi32> to vector<8x128xf32>
    %49 = arith.addf %3, %48 : vector<8x128xf32>
    %50 = arith.mulf %27, %35 : vector<8x128xf32>
    %c1_i32 = arith.constant 1 : i32
    %51 = vector.broadcast %c1_i32 : i32 to vector<8x128xi32>
    %52 = arith.cmpi eq, %8, %51 : vector<8x128xi32>
    %cst_17 = arith.constant 0.000000e+00 : f32
    %53 = vector.broadcast %cst_17 : f32 to vector<8x128xf32>
    %54 = arith.select %52, %50, %53 : vector<8x128xi1>, vector<8x128xf32>
    %55 = arith.addf %3, %54 : vector<8x128xf32>
    %cst_18 = arith.constant 0.000000e+00 : f32
    %56 = vector.broadcast %cst_18 : f32 to vector<8x128xf32>
    %57 = arith.select %37, %56, %50 : vector<8x128xi1>, vector<8x128xf32>
    %58 = arith.addf %3, %57 : vector<8x128xf32>
    %59 = arith.extui %52 : vector<8x128xi1> to vector<8x128xi32>
    %60 = arith.sitofp %59 : vector<8x128xi32> to vector<8x128xf32>
    %61 = arith.addf %3, %60 : vector<8x128xf32>
    %62 = arith.mulf %29, %35 : vector<8x128xf32>
    %c2_i32 = arith.constant 2 : i32
    %63 = vector.broadcast %c2_i32 : i32 to vector<8x128xi32>
    %64 = arith.cmpi eq, %8, %63 : vector<8x128xi32>
    %cst_19 = arith.constant 0.000000e+00 : f32
    %65 = vector.broadcast %cst_19 : f32 to vector<8x128xf32>
    %66 = arith.select %64, %62, %65 : vector<8x128xi1>, vector<8x128xf32>
    %67 = arith.addf %3, %66 : vector<8x128xf32>
    %cst_20 = arith.constant 0.000000e+00 : f32
    %68 = vector.broadcast %cst_20 : f32 to vector<8x128xf32>
    %69 = arith.select %37, %68, %62 : vector<8x128xi1>, vector<8x128xf32>
    %70 = arith.addf %3, %69 : vector<8x128xf32>
    %71 = arith.extui %64 : vector<8x128xi1> to vector<8x128xi32>
    %72 = arith.sitofp %71 : vector<8x128xi32> to vector<8x128xf32>
    %73 = arith.addf %3, %72 : vector<8x128xf32>
    %74 = arith.mulf %31, %35 : vector<8x128xf32>
    %c3_i32 = arith.constant 3 : i32
    %75 = vector.broadcast %c3_i32 : i32 to vector<8x128xi32>
    %76 = arith.cmpi eq, %8, %75 : vector<8x128xi32>
    %cst_21 = arith.constant 0.000000e+00 : f32
    %77 = vector.broadcast %cst_21 : f32 to vector<8x128xf32>
    %78 = arith.select %76, %74, %77 : vector<8x128xi1>, vector<8x128xf32>
    %79 = arith.addf %3, %78 : vector<8x128xf32>
    %cst_22 = arith.constant 0.000000e+00 : f32
    %80 = vector.broadcast %cst_22 : f32 to vector<8x128xf32>
    %81 = arith.select %37, %80, %74 : vector<8x128xi1>, vector<8x128xf32>
    %82 = arith.addf %3, %81 : vector<8x128xf32>
    %83 = arith.extui %76 : vector<8x128xi1> to vector<8x128xi32>
    %84 = arith.sitofp %83 : vector<8x128xi32> to vector<8x128xf32>
    %85 = arith.addf %3, %84 : vector<8x128xf32>
    %c1_i32_23 = arith.constant 1 : i32
    %c0_24 = arith.constant 0 : index
    %c0_25 = arith.constant 0 : index
    %c0_26 = arith.constant 0 : index
    %c0_27 = arith.constant 0 : index
    %c0_28 = arith.constant 0 : index
    %86 = vector.load %arg5[%c0_24, %c0_25, %c0_26, %c0_27, %c0_28] : memref<1x1x4x8x128xf32, #tpu.memory_space<vmem>>, vector<1x1x1x8x128xf32>
    %87 = vector.shape_cast %86 : vector<1x1x1x8x128xf32> to vector<8x128xf32>
    %88 = arith.addf %87, %43 : vector<8x128xf32>
    %c0_29 = arith.constant 0 : index
    %c0_30 = arith.constant 0 : index
    %c0_31 = arith.constant 0 : index
    %c0_32 = arith.constant 0 : index
    %c0_33 = arith.constant 0 : index
    %89 = vector.load %arg5[%c0_29, %c0_30, %c0_31, %c0_32, %c0_33] : memref<1x1x4x8x128xf32, #tpu.memory_space<vmem>>, vector<1x1x1x8x128xf32>
    %90 = vector.shape_cast %89 : vector<1x1x1x8x128xf32> to vector<8x128xf32>
    %91 = vector.shape_cast %88 : vector<8x128xf32> to vector<1x1x1x8x128xf32>
    tpu.vector_store %arg5[%c0_29, %c0_30, %c0_31, %c0_32, %c0_33], %91 {strides = array<i32>} : memref<1x1x4x8x128xf32, #tpu.memory_space<vmem>>, vector<1x1x1x8x128xf32>,
    %c0_34 = arith.constant 0 : index
    %c0_35 = arith.constant 0 : index
    %c0_36 = arith.constant 0 : index
    %c0_37 = arith.constant 0 : index
    %c0_38 = arith.constant 0 : index
    %92 = vector.load %arg6[%c0_34, %c0_35, %c0_36, %c0_37, %c0_38] : memref<1x1x4x8x128xf32, #tpu.memory_space<vmem>>, vector<1x1x1x8x128xf32>
    %93 = vector.shape_cast %92 : vector<1x1x1x8x128xf32> to vector<8x128xf32>
    %94 = arith.addf %93, %46 : vector<8x128xf32>
    %c0_39 = arith.constant 0 : index
    %c0_40 = arith.constant 0 : index
    %c0_41 = arith.constant 0 : index
    %c0_42 = arith.constant 0 : index
    %c0_43 = arith.constant 0 : index
    %95 = vector.load %arg6[%c0_39, %c0_40, %c0_41, %c0_42, %c0_43] : memref<1x1x4x8x128xf32, #tpu.memory_space<vmem>>, vector<1x1x1x8x128xf32>
    %96 = vector.shape_cast %95 : vector<1x1x1x8x128xf32> to vector<8x128xf32>
    %97 = vector.shape_cast %94 : vector<8x128xf32> to vector<1x1x1x8x128xf32>
    tpu.vector_store %arg6[%c0_39, %c0_40, %c0_41, %c0_42, %c0_43], %97 {strides = array<i32>} : memref<1x1x4x8x128xf32, #tpu.memory_space<vmem>>, vector<1x1x1x8x128xf32>,
    %c0_44 = arith.constant 0 : index
    %c0_45 = arith.constant 0 : index
    %c0_46 = arith.constant 0 : index
    %c0_47 = arith.constant 0 : index
    %c0_48 = arith.constant 0 : index
    %98 = vector.load %arg7[%c0_44, %c0_45, %c0_46, %c0_47, %c0_48] : memref<1x1x4x8x128xf32, #tpu.memory_space<vmem>>, vector<1x1x1x8x128xf32>
    %99 = vector.shape_cast %98 : vector<1x1x1x8x128xf32> to vector<8x128xf32>
    %100 = arith.addf %99, %49 : vector<8x128xf32>
    %c0_49 = arith.constant 0 : index
    %c0_50 = arith.constant 0 : index
    %c0_51 = arith.constant 0 : index
    %c0_52 = arith.constant 0 : index
    %c0_53 = arith.constant 0 : index
    %101 = vector.load %arg7[%c0_49, %c0_50, %c0_51, %c0_52, %c0_53] : memref<1x1x4x8x128xf32, #tpu.memory_space<vmem>>, vector<1x1x1x8x128xf32>
    %102 = vector.shape_cast %101 : vector<1x1x1x8x128xf32> to vector<8x128xf32>
    %103 = vector.shape_cast %100 : vector<8x128xf32> to vector<1x1x1x8x128xf32>
    tpu.vector_store %arg7[%c0_49, %c0_50, %c0_51, %c0_52, %c0_53], %103 {strides = array<i32>} : memref<1x1x4x8x128xf32, #tpu.memory_space<vmem>>, vector<1x1x1x8x128xf32>,
    %c0_54 = arith.constant 0 : index
    %c0_55 = arith.constant 0 : index
    %c1_56 = arith.constant 1 : index
    %c0_57 = arith.constant 0 : index
    %c0_58 = arith.constant 0 : index
    %104 = vector.load %arg5[%c0_54, %c0_55, %c1_56, %c0_57, %c0_58] : memref<1x1x4x8x128xf32, #tpu.memory_space<vmem>>, vector<1x1x1x8x128xf32>
    %105 = vector.shape_cast %104 : vector<1x1x1x8x128xf32> to vector<8x128xf32>
    %106 = arith.addf %105, %55 : vector<8x128xf32>
    %c0_59 = arith.constant 0 : index
    %c0_60 = arith.constant 0 : index
    %c1_61 = arith.constant 1 : index
    %c0_62 = arith.constant 0 : index
    %c0_63 = arith.constant 0 : index
    %107 = vector.load %arg5[%c0_59, %c0_60, %c1_61, %c0_62, %c0_63] : memref<1x1x4x8x128xf32, #tpu.memory_space<vmem>>, vector<1x1x1x8x128xf32>
    %108 = vector.shape_cast %107 : vector<1x1x1x8x128xf32> to vector<8x128xf32>
    %109 = vector.shape_cast %106 : vector<8x128xf32> to vector<1x1x1x8x128xf32>
    tpu.vector_store %arg5[%c0_59, %c0_60, %c1_61, %c0_62, %c0_63], %109 {strides = array<i32>} : memref<1x1x4x8x128xf32, #tpu.memory_space<vmem>>, vector<1x1x1x8x128xf32>,
    %c0_64 = arith.constant 0 : index
    %c0_65 = arith.constant 0 : index
    %c1_66 = arith.constant 1 : index
    %c0_67 = arith.constant 0 : index
    %c0_68 = arith.constant 0 : index
    %110 = vector.load %arg6[%c0_64, %c0_65, %c1_66, %c0_67, %c0_68] : memref<1x1x4x8x128xf32, #tpu.memory_space<vmem>>, vector<1x1x1x8x128xf32>
    %111 = vector.shape_cast %110 : vector<1x1x1x8x128xf32> to vector<8x128xf32>
    %112 = arith.addf %111, %58 : vector<8x128xf32>
    %c0_69 = arith.constant 0 : index
    %c0_70 = arith.constant 0 : index
    %c1_71 = arith.constant 1 : index
    %c0_72 = arith.constant 0 : index
    %c0_73 = arith.constant 0 : index
    %113 = vector.load %arg6[%c0_69, %c0_70, %c1_71, %c0_72, %c0_73] : memref<1x1x4x8x128xf32, #tpu.memory_space<vmem>>, vector<1x1x1x8x128xf32>
    %114 = vector.shape_cast %113 : vector<1x1x1x8x128xf32> to vector<8x128xf32>
    %115 = vector.shape_cast %112 : vector<8x128xf32> to vector<1x1x1x8x128xf32>
    tpu.vector_store %arg6[%c0_69, %c0_70, %c1_71, %c0_72, %c0_73], %115 {strides = array<i32>} : memref<1x1x4x8x128xf32, #tpu.memory_space<vmem>>, vector<1x1x1x8x128xf32>,
    %c0_74 = arith.constant 0 : index
    %c0_75 = arith.constant 0 : index
    %c1_76 = arith.constant 1 : index
    %c0_77 = arith.constant 0 : index
    %c0_78 = arith.constant 0 : index
    %116 = vector.load %arg7[%c0_74, %c0_75, %c1_76, %c0_77, %c0_78] : memref<1x1x4x8x128xf32, #tpu.memory_space<vmem>>, vector<1x1x1x8x128xf32>
    %117 = vector.shape_cast %116 : vector<1x1x1x8x128xf32> to vector<8x128xf32>
    %118 = arith.addf %117, %61 : vector<8x128xf32>
    %c0_79 = arith.constant 0 : index
    %c0_80 = arith.constant 0 : index
    %c1_81 = arith.constant 1 : index
    %c0_82 = arith.constant 0 : index
    %c0_83 = arith.constant 0 : index
    %119 = vector.load %arg7[%c0_79, %c0_80, %c1_81, %c0_82, %c0_83] : memref<1x1x4x8x128xf32, #tpu.memory_space<vmem>>, vector<1x1x1x8x128xf32>
    %120 = vector.shape_cast %119 : vector<1x1x1x8x128xf32> to vector<8x128xf32>
    %121 = vector.shape_cast %118 : vector<8x128xf32> to vector<1x1x1x8x128xf32>
    tpu.vector_store %arg7[%c0_79, %c0_80, %c1_81, %c0_82, %c0_83], %121 {strides = array<i32>} : memref<1x1x4x8x128xf32, #tpu.memory_space<vmem>>, vector<1x1x1x8x128xf32>,
    %c0_84 = arith.constant 0 : index
    %c0_85 = arith.constant 0 : index
    %c2_86 = arith.constant 2 : index
    %c0_87 = arith.constant 0 : index
    %c0_88 = arith.constant 0 : index
    %122 = vector.load %arg5[%c0_84, %c0_85, %c2_86, %c0_87, %c0_88] : memref<1x1x4x8x128xf32, #tpu.memory_space<vmem>>, vector<1x1x1x8x128xf32>
    %123 = vector.shape_cast %122 : vector<1x1x1x8x128xf32> to vector<8x128xf32>
    %124 = arith.addf %123, %67 : vector<8x128xf32>
    %c0_89 = arith.constant 0 : index
    %c0_90 = arith.constant 0 : index
    %c2_91 = arith.constant 2 : index
    %c0_92 = arith.constant 0 : index
    %c0_93 = arith.constant 0 : index
    %125 = vector.load %arg5[%c0_89, %c0_90, %c2_91, %c0_92, %c0_93] : memref<1x1x4x8x128xf32, #tpu.memory_space<vmem>>, vector<1x1x1x8x128xf32>
    %126 = vector.shape_cast %125 : vector<1x1x1x8x128xf32> to vector<8x128xf32>
    %127 = vector.shape_cast %124 : vector<8x128xf32> to vector<1x1x1x8x128xf32>
    tpu.vector_store %arg5[%c0_89, %c0_90, %c2_91, %c0_92, %c0_93], %127 {strides = array<i32>} : memref<1x1x4x8x128xf32, #tpu.memory_space<vmem>>, vector<1x1x1x8x128xf32>,
    %c0_94 = arith.constant 0 : index
    %c0_95 = arith.constant 0 : index
    %c2_96 = arith.constant 2 : index
    %c0_97 = arith.constant 0 : index
    %c0_98 = arith.constant 0 : index
    %128 = vector.load %arg6[%c0_94, %c0_95, %c2_96, %c0_97, %c0_98] : memref<1x1x4x8x128xf32, #tpu.memory_space<vmem>>, vector<1x1x1x8x128xf32>
    %129 = vector.shape_cast %128 : vector<1x1x1x8x128xf32> to vector<8x128xf32>
    %130 = arith.addf %129, %70 : vector<8x128xf32>
    %c0_99 = arith.constant 0 : index
    %c0_100 = arith.constant 0 : index
    %c2_101 = arith.constant 2 : index
    %c0_102 = arith.constant 0 : index
    %c0_103 = arith.constant 0 : index
    %131 = vector.load %arg6[%c0_99, %c0_100, %c2_101, %c0_102, %c0_103] : memref<1x1x4x8x128xf32, #tpu.memory_space<vmem>>, vector<1x1x1x8x128xf32>
    %132 = vector.shape_cast %131 : vector<1x1x1x8x128xf32> to vector<8x128xf32>
    %133 = vector.shape_cast %130 : vector<8x128xf32> to vector<1x1x1x8x128xf32>
    tpu.vector_store %arg6[%c0_99, %c0_100, %c2_101, %c0_102, %c0_103], %133 {strides = array<i32>} : memref<1x1x4x8x128xf32, #tpu.memory_space<vmem>>, vector<1x1x1x8x128xf32>,
    %c0_104 = arith.constant 0 : index
    %c0_105 = arith.constant 0 : index
    %c2_106 = arith.constant 2 : index
    %c0_107 = arith.constant 0 : index
    %c0_108 = arith.constant 0 : index
    %134 = vector.load %arg7[%c0_104, %c0_105, %c2_106, %c0_107, %c0_108] : memref<1x1x4x8x128xf32, #tpu.memory_space<vmem>>, vector<1x1x1x8x128xf32>
    %135 = vector.shape_cast %134 : vector<1x1x1x8x128xf32> to vector<8x128xf32>
    %136 = arith.addf %135, %73 : vector<8x128xf32>
    %c0_109 = arith.constant 0 : index
    %c0_110 = arith.constant 0 : index
    %c2_111 = arith.constant 2 : index
    %c0_112 = arith.constant 0 : index
    %c0_113 = arith.constant 0 : index
    %137 = vector.load %arg7[%c0_109, %c0_110, %c2_111, %c0_112, %c0_113] : memref<1x1x4x8x128xf32, #tpu.memory_space<vmem>>, vector<1x1x1x8x128xf32>
    %138 = vector.shape_cast %137 : vector<1x1x1x8x128xf32> to vector<8x128xf32>
    %139 = vector.shape_cast %136 : vector<8x128xf32> to vector<1x1x1x8x128xf32>
    tpu.vector_store %arg7[%c0_109, %c0_110, %c2_111, %c0_112, %c0_113], %139 {strides = array<i32>} : memref<1x1x4x8x128xf32, #tpu.memory_space<vmem>>, vector<1x1x1x8x128xf32>,
    %c0_114 = arith.constant 0 : index
    %c0_115 = arith.constant 0 : index
    %c3_116 = arith.constant 3 : index
    %c0_117 = arith.constant 0 : index
    %c0_118 = arith.constant 0 : index
    %140 = vector.load %arg5[%c0_114, %c0_115, %c3_116, %c0_117, %c0_118] : memref<1x1x4x8x128xf32, #tpu.memory_space<vmem>>, vector<1x1x1x8x128xf32>
    %141 = vector.shape_cast %140 : vector<1x1x1x8x128xf32> to vector<8x128xf32>
    %142 = arith.addf %141, %79 : vector<8x128xf32>
    %c0_119 = arith.constant 0 : index
    %c0_120 = arith.constant 0 : index
    %c3_121 = arith.constant 3 : index
    %c0_122 = arith.constant 0 : index
    %c0_123 = arith.constant 0 : index
    %143 = vector.load %arg5[%c0_119, %c0_120, %c3_121, %c0_122, %c0_123] : memref<1x1x4x8x128xf32, #tpu.memory_space<vmem>>, vector<1x1x1x8x128xf32>
    %144 = vector.shape_cast %143 : vector<1x1x1x8x128xf32> to vector<8x128xf32>
    %145 = vector.shape_cast %142 : vector<8x128xf32> to vector<1x1x1x8x128xf32>
    tpu.vector_store %arg5[%c0_119, %c0_120, %c3_121, %c0_122, %c0_123], %145 {strides = array<i32>} : memref<1x1x4x8x128xf32, #tpu.memory_space<vmem>>, vector<1x1x1x8x128xf32>,
    %c0_124 = arith.constant 0 : index
    %c0_125 = arith.constant 0 : index
    %c3_126 = arith.constant 3 : index
    %c0_127 = arith.constant 0 : index
    %c0_128 = arith.constant 0 : index
    %146 = vector.load %arg6[%c0_124, %c0_125, %c3_126, %c0_127, %c0_128] : memref<1x1x4x8x128xf32, #tpu.memory_space<vmem>>, vector<1x1x1x8x128xf32>
    %147 = vector.shape_cast %146 : vector<1x1x1x8x128xf32> to vector<8x128xf32>
    %148 = arith.addf %147, %82 : vector<8x128xf32>
    %c0_129 = arith.constant 0 : index
    %c0_130 = arith.constant 0 : index
    %c3_131 = arith.constant 3 : index
    %c0_132 = arith.constant 0 : index
    %c0_133 = arith.constant 0 : index
    %149 = vector.load %arg6[%c0_129, %c0_130, %c3_131, %c0_132, %c0_133] : memref<1x1x4x8x128xf32, #tpu.memory_space<vmem>>, vector<1x1x1x8x128xf32>
    %150 = vector.shape_cast %149 : vector<1x1x1x8x128xf32> to vector<8x128xf32>
    %151 = vector.shape_cast %148 : vector<8x128xf32> to vector<1x1x1x8x128xf32>
    tpu.vector_store %arg6[%c0_129, %c0_130, %c3_131, %c0_132, %c0_133], %151 {strides = array<i32>} : memref<1x1x4x8x128xf32, #tpu.memory_space<vmem>>, vector<1x1x1x8x128xf32>,
    %c0_134 = arith.constant 0 : index
    %c0_135 = arith.constant 0 : index
    %c3_136 = arith.constant 3 : index
    %c0_137 = arith.constant 0 : index
    %c0_138 = arith.constant 0 : index
    %152 = vector.load %arg7[%c0_134, %c0_135, %c3_136, %c0_137, %c0_138] : memref<1x1x4x8x128xf32, #tpu.memory_space<vmem>>, vector<1x1x1x8x128xf32>
    %153 = vector.shape_cast %152 : vector<1x1x1x8x128xf32> to vector<8x128xf32>
    %154 = arith.addf %153, %85 : vector<8x128xf32>
    %c0_139 = arith.constant 0 : index
    %c0_140 = arith.constant 0 : index
    %c3_141 = arith.constant 3 : index
    %c0_142 = arith.constant 0 : index
    %c0_143 = arith.constant 0 : index
    %155 = vector.load %arg7[%c0_139, %c0_140, %c3_141, %c0_142, %c0_143] : memref<1x1x4x8x128xf32, #tpu.memory_space<vmem>>, vector<1x1x1x8x128xf32>
    %156 = vector.shape_cast %155 : vector<1x1x1x8x128xf32> to vector<8x128xf32>
    %157 = vector.shape_cast %154 : vector<8x128xf32> to vector<1x1x1x8x128xf32>
    tpu.vector_store %arg7[%c0_139, %c0_140, %c3_141, %c0_142, %c0_143], %157 {strides = array<i32>} : memref<1x1x4x8x128xf32, #tpu.memory_space<vmem>>, vector<1x1x1x8x128xf32>,
    return
  }
  func.func @transform_0(%arg0: i32, %arg1: i32, %arg2: i32) -> (i32, i32, i32, i32) {
    %c1_i32 = arith.constant 1 : i32
    %0 = arith.muli %arg1, %c1_i32 : i32
    %1 = arith.addi %0, %arg2 : i32
    %c0_i32 = arith.constant 0 : i32
    %c0_i32_0 = arith.constant 0 : i32
    %c0_i32_1 = arith.constant 0 : i32
    return %arg0, %c0_i32, %1, %c0_i32_0 : i32, i32, i32, i32
  }
  func.func @transform_1(%arg0: i32, %arg1: i32, %arg2: i32) -> (i32, i32, i32, i32) {
    %c1_i32 = arith.constant 1 : i32
    %0 = arith.muli %arg1, %c1_i32 : i32
    %1 = arith.addi %0, %arg2 : i32
    %c0_i32 = arith.constant 0 : i32
    %c0_i32_0 = arith.constant 0 : i32
    %c0_i32_1 = arith.constant 0 : i32
    return %arg0, %c0_i32, %1, %c0_i32_0 : i32, i32, i32, i32
  }
  func.func @transform_2(%arg0: i32, %arg1: i32, %arg2: i32) -> (i32, i32, i32, i32, i32) {
    %c0_i32 = arith.constant 0 : i32
    %c0_i32_0 = arith.constant 0 : i32
    %c0_i32_1 = arith.constant 0 : i32
    %c0_i32_2 = arith.constant 0 : i32
    return %arg0, %arg1, %c0_i32, %c0_i32_0, %c0_i32_1 : i32, i32, i32, i32, i32
  }
  func.func @transform_3(%arg0: i32, %arg1: i32, %arg2: i32) -> (i32, i32, i32, i32, i32) {
    %c0_i32 = arith.constant 0 : i32
    %c0_i32_0 = arith.constant 0 : i32
    %c0_i32_1 = arith.constant 0 : i32
    %c0_i32_2 = arith.constant 0 : i32
    return %arg0, %arg1, %c0_i32, %c0_i32_0, %c0_i32_1 : i32, i32, i32, i32, i32
  }
  func.func @transform_4(%arg0: i32, %arg1: i32, %arg2: i32) -> (i32, i32, i32, i32, i32) {
    %c0_i32 = arith.constant 0 : i32
    %c0_i32_0 = arith.constant 0 : i32
    %c0_i32_1 = arith.constant 0 : i32
    %c0_i32_2 = arith.constant 0 : i32
    return %arg0, %arg1, %c0_i32, %c0_i32_0, %c0_i32_1 : i32, i32, i32, i32, i32
  }
}

</mosaic_0001>

<bundles_post_ra>
// kernel: tpu_custom_call.1
= control target key start
LH: loop header
LB: loop body
LE: loop exit
PB: predicated region body
PF: predicated region fallthrough
CT: control target
= control target key end

     0   :  { %s1360_s0 = inlined_call_operand.hbm [shape: f32[2,4,8,128], index: 0, kind: input, shape index: {}]   ;;  %s1361_s1 = inlined_call_operand.hbm [shape: s32[2,1,8,128], index: 1, kind: input, shape index: {}]   ;;  %s1362_s2 = inlined_call_operand.hbm [shape: f32[2,1,4,8,128], index: 2, kind: output, shape index: {0}]   ;;  %s1363_s3 = inlined_call_operand.hbm [shape: f32[2,1,4,8,128], index: 3, kind: output, shape index: {1}]   ;;  %s1364_s4 = inlined_call_operand.hbm [shape: f32[2,1,4,8,128], index: 4, kind: output, shape index: {2}]  }
   0x1   :  { %1367 = sst [smem:[#allocation17_spill]] %s1360_s0 }
   0x2   :  { %10 = vsyncpa [#allocation3], 0 }
   0x3   :  { %12 = vsyncpa [#allocation3 + $0x1], 0 }
   0x4   :  { %13 = vsyncpa [#allocation6], 0 }
   0x5   :  { %15 = vsyncpa [#allocation6 + $0x1], 0 }
   0x6   :  { %16 = vsyncpa [#allocation4], 0 }
   0x7   :  { %18 = vsyncpa [#allocation4 + $0x1], 0 }
   0x8   :  { %19 = vsyncpa [#allocation9], 0 }
   0x9   :  { %21 = vsyncpa [#allocation9 + $0x1], 0  ;;  %s1065_s15 = smov 0   ;;  %s1067_s16 = smov 0  }
   0xa   :  { %s1069_s17 = smov 0   ;;  %s1071_s18 = smov 0  }
   0xb   :  { %s1073_s19 = smov 0   ;;  %s1075_s20 = smov 0  }
   0xc LB: > { %s1096_s21 = sadd.s32 4294967295, %s1028_s20   ;;  %s1365_s22 = sadd.s32 4294967294, %s1028_s20   ;;  %s1028_s20 = sphi %s1075_s20, %s27_s20   ;;  %s1024_s19 = sphi %s1073_s19, %s1384_s19   ;;  %s1020_s18 = sphi %s1071_s18, %s1383_s18   ;;  %s1016_s17 = sphi %s1069_s17, %s1382_s17   ;;  %s1012_s16 = sphi %s1067_s16, %s1381_s16   ;;  %s1008_s15 = sphi %s1065_s15, %s1380_s15  }
   0xd   : > { %s46_s23 = sadd.s32 1, %s1024_s19  ;;  %s57_s24 = sadd.s32 1, %s1016_s17 }
   0xe   : > { %p48_p0 = scmp.ge.s32.totalorder %s46_s23, 2  ;;  %p64_p1 = scmp.ne.s32.totalorder %s1016_s17, %s1012_s16 }
   0xf   : > { %p65_p2 = scmp.eq.s32.totalorder %s1028_s20, 0  ;;  %p70_p3 = scmp.ne.s32.totalorder %s1012_s16, %s1008_s15 }
  0x10   : > { %s1386_s23 = smov (%p48_p0, %s46_s23), 0  ;;  %p71_p5 = scmp.eq.s32.totalorder %s1096_s21, 0 }
  0x11   : > { %1368 = sst [smem:[#allocation15_spill]] %s1386_s23  ;;  %p1108_p4 = por %p65_p2, %p64_p1 }
  0x12   : > { %s52_s26 = ssub.s32 %s1024_s19, %s1386_s23  ;;  %p126_p6 = scmp.eq.s32.totalorder %s1096_s21, 1 }
  0x13   : > { %p55_p7 = scmp.eq.s32.totalorder %s52_s26, 0  ;;  %p1116_p8 = por %p71_p5, %p70_p3 }
  0x14   : > { %p1120_p9 = por %p126_p6, %p64_p1  ;;  %p132_p10 = scmp.eq.s32.totalorder %s1365_s22, 1 }
  0x15   : > { %s1127_s29 = scalar_select %p55_p7, %s1016_s17, %s57_s24  }
  0x16   : > { %p1129_p11 = por %p132_p10, %p70_p3  ;;  %p688_p12 = scmp.ge.s32.totalorder %s1028_s20, 2 }
  0x17   : > { %1372 = sst [smem:[#allocation16_spill]] %s1127_s29  ;;  %p767_p13 = scmp.lt.s32.totalorder %s1028_s20, 2 }
  0x18   : > { %s1136_s5 = sand.u32 1, %s1016_s17   ;;  %s736_s7 = sshll.u32 %s1024_s19, 9 }
  0x19   : > { %s689_s6 = sshll.u32 %s1136_s5, 5  ;;  %s1374_s0 = sld [smem:[#allocation17_spill]] }
  0x1a   : > { %s212_s11 = scalar_lea.vmem [#allocation2], %s689_s6  ;;  %p1145_p0 = pnand %p767_p13, %p1108_p4 }
  0x1b   : > { %s221_s12 = sshll.u32 %s212_s11, 4  ;;  %p694_p1 = scmp.ge.s32.totalorder %s1028_s20, 1  ;;  %s222_s12 = int_to_ptr.vmem [resolvable:$true] %s221_s12 }
  0x1c   : > { %s209_s14 = scalar_lea.sflag [#allocation3], %s1136_s5  ;;  %p834_p2 = pneg %p1145_p0 }
  0x1d   : > { %s845_s24 = scalar_lea.vmem %s222_s12, 512  ;;  %s1030_s26 = smov [#allocation2]  }
  0x1e   : > { %p846_p3 = scmp.ne.s32.totalorder %s222_s12, %s845_s24  ;;  %s850_s6 = sshll.u32 %s1030_s26, 4  ;;  %s851_s6 = int_to_ptr.vmem [resolvable:$false] %s850_s6 }
  0x1f   : > { %s220_s10 = scalar_lea.hbm %s1374_s0, %s736_s7  ;;  %s852_s25 = scalar_lea.vmem %s851_s6, 1024 }
  0x20   : > { %p848_p5 = pnand %p846_p3, %p834_p2  ;;  %p853_p4 = scmp.lt.s32.totalorder %s222_s12, %s851_s6 }
  0x21   : > { %p854_p7 = scmp.lt.s32.totalorder %s852_s25, %s845_s24 }
  0x22   : > { %p849_p6 = pneg %p848_p5 }
  0x23   : > { %p855_p10 = por %p854_p7, %p853_p4 }
  0x25   : > { %p856_p13 = pnand %p855_p10, %p849_p6 }
  0x27   : > { %859 = shalt.err (!%p856_p13)
}
  0x28   : > { %s1031_s7 = smov 128   ;;  %s1032_s8 = smov 8  }
  0x29   : > { %753 = dma.hbm_to_vmem [thread:$0]  (!%p1145_p0), %s220_s10, 512, %s222_s12, %s209_s14, %s1031_s7, %s1031_s7, %s1032_s8  }
  0x2a   : > { %p249_p3 = scmp.lt.s32.totalorder %s1028_s20, 3  ;;  %s692_s9 = sshll.u32 %s1136_s5, 3 }
  0x2b   : > { %s693_s11 = sshll.u32 %s1024_s19, 7  ;;  %s235_s22 = scalar_lea.vmem [#allocation5], %s692_s9 }
  0x2c   : > { %p1163_p5 = pnand %p694_p1, %p249_p3  ;;  %s242_s25 = scalar_lea.hbm %s1361_s1, %s693_s11 }
  0x2d   : > { %s244_s0 = sshll.u32 %s235_s22, 4  ;;  %s232_s23 = scalar_lea.sflag [#allocation6], %s1136_s5  ;;  %s245_s0 = int_to_ptr.vmem [resolvable:$true] %s244_s0 }
  0x2e   : > { %s873_s29 = scalar_lea.vmem %s245_s0, 128  ;;  %s1033_s10 = smov [#allocation5]  }
  0x2f   : > { %p874_p6 = scmp.ne.s32.totalorder %s245_s0, %s873_s29  ;;  %s878_s12 = sshll.u32 %s1033_s10, 4  ;;  %s879_s12 = int_to_ptr.vmem [resolvable:$false] %s878_s12 }
  0x30   : > { %s880_s14 = scalar_lea.vmem %s879_s12, 256  ;;  %p881_p1 = scmp.lt.s32.totalorder %s245_s0, %s879_s12 }
  0x31   : > { %p876_p4 = pnand %p874_p6, %p834_p2  ;;  %p882_p10 = scmp.lt.s32.totalorder %s880_s14, %s873_s29 }
  0x33   : > { %p877_p7 = pneg %p876_p4  ;;  %p883_p13 = por %p882_p10, %p881_p1 }
  0x35   : > { %p884_p3 = pnand %p883_p13, %p877_p7 }
  0x37   : > { %887 = shalt.err (!%p884_p3)
}
  0x38   : > { %756 = dma.hbm_to_vmem [thread:$0]  (!%p1145_p0), %s242_s25, 128, %s245_s0, %s232_s23  }
  0x39   : > { %253 = sbr.rel (%p1163_p5) target bundleno = 174 (0xae), region = 28  ;;  %s1179_s22 = sand.u32 (!%p1163_p5), 1, %s1012_s16  }
  0x3a   : > { %s1182_s5 = sshll.u32 (!%p1163_p5), %s1179_s22, 5  ;;  %s256_s7 = scalar_lea.sflag (!%p1163_p5), [#allocation3], %s1179_s22 }
  0x3b   : > { %s259_s29 = scalar_lea.vmem (!%p1163_p5), [#allocation2], %s1182_s5 }
  0x3e   : > { %991 = dma.done.wait (%p1116_p8), %s256_s7, 512  }
  0x3f   : > { %993 = vsyncadd (%p1116_p8), %s256_s7, 4294966784  ;;  %s696_s0 = sshll.u32 %s1179_s22, 3  ;;  %s265_s23 = scalar_lea.sflag [#allocation6], %s1179_s22 }
  0x40   : > { %s268_s13 = scalar_lea.vmem [#allocation5], %s696_s0 }
  0x41   : > { %995 = dma.done.wait (%p1116_p8), %s265_s23, 128  }
  0x42   : > { %997 = vsyncadd (%p1116_p8), %s265_s23, 4294967168  ;;  %v1196_v0 = vld [vmem:[%s268_s13] sm:$0xff]  ;;  %v701_v3 = vld [vmem:[%s259_s29 + $0x10] sm:$0xff]  ;;  %v1034_v6 = vmov 0.0   ;;  %s1211_s27 = scalar_lea.vmem [#allocation10], %s1182_s5  ;;  %s443_s8 = sand.u32 1, %s1096_s21  }
  0x43   : > { %v327_v1 = vld [vmem:[%s259_s29] sm:$0xff]  ;;  %v700_v2 = vld [vmem:[%s259_s29 + $0x8] sm:$0xff]  ;;  %vm358_vm0 = vcmp.eq.s32.totalorder %v1196_v0, 0  ;;  %vm367_vm1 = vcmp.eq.s32.totalorder %v1196_v0, 1  ;;  %v702_v5 = vld [vmem:[%s259_s29 + $0x18] sm:$0xff]  ;;  %vm376_vm2 = vcmp.eq.s32.totalorder %v1196_v0, 2 }
  0x44   : > { %v337_v4 = vmax.f32 %v327_v1, %v700_v2  ;;  %v703_v7 = vsel %vm358_vm0, 1.0, %v1034_v6  ;;  %v704_v8 = vsel %vm367_vm1, 1.0, %v1034_v6  ;;  %vm385_vm3 = vcmp.eq.s32.totalorder %v1196_v0, 3  ;;  %s737_s9 = sshll.u32 %s1020_s18, 9  ;;  %s300_s11 = scalar_lea.vmem [#allocation8], %s1182_s5 }
  0x45   : > { %v705_v10 = vsel %vm376_vm2, 1.0, %v1034_v6  ;;  %v706_v11 = vsel %vm385_vm3, 1.0, %v1034_v6  ;;  %401 = vst [vmem:[%s1211_s27] sm:$0xff] %v703_v7  ;;  %712 = vst [vmem:[%s1211_s27 + $0x8] sm:$0xff] %v704_v8  ;;  %vm356_vm4 = vcmp.lt.s32.totalorder %v1196_v0, 0  ;;  %s482_s24 = sshll.u32 %s300_s11, 4  ;;  %s500_s26 = sshll.u32 %s1211_s27, 4  ;;  %s1231_s24 = int_to_ptr.vmem [resolvable:$true] %s482_s24  ;;  %s1246_s26 = int_to_ptr.vmem [resolvable:$true] %s500_s26 }
  0x46   : > { %v338_v9 = vmax.f32 %v337_v4, %v701_v3  ;;  %718 = vst [vmem:[%s1211_s27 + $0x10] sm:$0xff] %v705_v10  ;;  %724 = vst [vmem:[%s1211_s27 + $0x18] sm:$0xff] %v706_v11  ;;  %s1225_s10 = scalar_lea.hbm %s1363_s3, %s737_s9  ;;  %s1228_s12 = scalar_lea.vmem [#allocation7], %s1182_s5 }
  0x47   : > { %s464_s18 = sshll.u32 %s1228_s12, 4  ;;  %s1236_s29 = scalar_lea.hbm %s1364_s4, %s737_s9  ;;  %s1253_s18 = int_to_ptr.vmem [resolvable:$true] %s464_s18 }
  0x48   : > { %v339_v12 = vmax.f32 %v338_v9, %v702_v5  ;;  %s1251_s23 = scalar_lea.hbm %s1362_s2, %s737_s9  ;;  %s1257_s13 = scalar_lea.sflag [#allocation9], %s443_s8 }
  0x49   : > { %s888_s27 = scalar_lea.vmem %s1231_s24, 512  ;;  %s1035_s6 = smov [#allocation8]  }
  0x4a   : > { %v340_v13 = vsub.f32 %v327_v1, %v339_v12  ;;  %v343_v14 = vsub.f32 %v700_v2, %v339_v12  ;;  %v346_v15 = vsub.f32 %v701_v3, %v339_v12  ;;  %v349_v16 = vsub.f32 %v702_v5, %v339_v12  ;;  %p889_p8 = scmp.ne.s32.totalorder %s1231_s24, %s888_s27  ;;  %s892_s25 = sshll.u32 %s1035_s6, 4  ;;  %s893_s25 = int_to_ptr.vmem [resolvable:$false] %s892_s25 }
  0x4b   : > { %s894_s14 = scalar_lea.vmem %s893_s25, 1024  ;;  %p895_p5 = scmp.lt.s32.totalorder %s1231_s24, %s893_s25 }
  0x4c   : > { %v341_v17 = vmul.f32 1.442695, %v340_v13  ;;  %v344_v18 = vmul.f32 1.442695, %v343_v14  ;;  %v347_v19 = vmul.f32 1.442695, %v346_v15  ;;  %p890_p0 = pnand %p889_p8, %p1120_p9  ;;  %p896_p6 = scmp.lt.s32.totalorder %s894_s14, %s888_s27 }
  0x4d   : > { %v350_v20 = vmul.f32 1.442695, %v349_v16 }
  0x4e   : > { %822 = vpow2.f32 %v341_v17  ;;  %p891_p2 = pneg %p890_p0  ;;  %p897_p4 = por %p896_p6, %p895_p5 }
  0x4f   : > { %824 = vpow2.f32 %v344_v18 }
  0x50   : > { %826 = vpow2.f32 %v347_v19  ;;  %p898_p7 = pnand %p897_p4, %p891_p2 }
  0x51   : > { %828 = vpow2.f32 %v350_v20 }
  0x5b   : > { %v823_v21 = vpop.eup %822 }
  0x5c   : > { %v825_v22 = vpop.eup %824 }
  0x5d   : > { %v827_v23 = vpop.eup %826  ;;  %v352_v24 = vadd.f32 %v825_v22, %v823_v21 }
  0x5e   : > { %v829_v25 = vpop.eup %828 }
  0x5f   : > { %v353_v26 = vadd.f32 %v827_v23, %v352_v24 }
  0x61   : > { %v354_v27 = vadd.f32 %v829_v25, %v353_v26 }
  0x63   : > { %830 = vrcp.f32 %v354_v27 }
  0x70   : > { %v831_v28 = vpop.eup %830 }
  0x71   : > { %v357_v29 = vmul.f32 %v831_v28, %v823_v21  ;;  %v366_v30 = vmul.f32 %v831_v28, %v825_v22  ;;  %v375_v31 = vmul.f32 %v831_v28, %v827_v23  ;;  %v384_v32 = vmul.f32 %v831_v28, %v829_v25 }
  0x73   : > { %v361_v33 = vsel %vm356_vm4, 0.0, %v357_v29  ;;  %v370_v34 = vsel %vm356_vm4, 0.0, %v366_v30  ;;  %v379_v35 = vsel %vm356_vm4, 0.0, %v375_v31  ;;  %v388_v36 = vsel %vm356_vm4, 0.0, %v384_v32 }
  0x74   : > { %v359_v37 = vsel %vm358_vm0, %v357_v29, 0.0  ;;  %v368_v38 = vsel %vm367_vm1, %v366_v30, 0.0  ;;  %v377_v39 = vsel %vm376_vm2, %v375_v31, 0.0  ;;  %v386_v40 = vsel %vm385_vm3, %v384_v32, 0.0  ;;  %398 = vst [vmem:[%s300_s11] sm:$0xff] %v361_v33  ;;  %710 = vst [vmem:[%s300_s11 + $0x8] sm:$0xff] %v370_v34 }
  0x75   : > { %716 = vst [vmem:[%s300_s11 + $0x10] sm:$0xff] %v379_v35  ;;  %722 = vst [vmem:[%s300_s11 + $0x18] sm:$0xff] %v388_v36 }
  0x76   : > { %901 = shalt.err (!%p898_p7)
}
  0x77   : > { %s902_s21 = scalar_lea.hbm %s1225_s10, 512  ;;  %s906_s11 = scalar_lea.hbm %s1363_s3, 1024 }
  0x78   : > { %p903_p1 = scmp.ne.s32.totalorder %s1225_s10, %s902_s21  ;;  %p907_p3 = scmp.lt.s32.totalorder %s1225_s10, %s1363_s3 }
  0x79   : > { %p908_p8 = scmp.lt.s32.totalorder %s906_s11, %s902_s21 }
  0x7a   : > { %p904_p10 = pnand %p903_p1, %p1120_p9 }
  0x7b   : > { %p909_p0 = por %p908_p8, %p907_p3 }
  0x7c   : > { %p905_p13 = pneg %p904_p10 }
  0x7e   : > { %p910_p2 = pnand %p909_p0, %p905_p13 }
  0x80   : > { %913 = shalt.err (!%p910_p2)
}
  0x81   : > { %s1036_s0 = smov 128   ;;  %s1037_s27 = smov 8   ;;  %395 = vst [vmem:[%s1228_s12] sm:$0xff] %v359_v37  ;;  %708 = vst [vmem:[%s1228_s12 + $0x8] sm:$0xff] %v368_v38 }
  0x82   : > { %745 = dma.vmem_to_hbm [thread:$0]  (%p1120_p9), %s1231_s24, 512, %s1225_s10, %s1257_s13, %s1036_s0, %s1036_s0, %s1037_s27  }
  0x83   : > { %714 = vst [vmem:[%s1228_s12 + $0x10] sm:$0xff] %v377_v39  ;;  %720 = vst [vmem:[%s1228_s12 + $0x18] sm:$0xff] %v386_v40  ;;  %s914_s6 = scalar_lea.vmem %s1246_s26, 512  ;;  %s1038_s25 = smov [#allocation10]  }
  0x84   : > { %p915_p5 = scmp.ne.s32.totalorder %s1246_s26, %s914_s6  ;;  %s918_s14 = sshll.u32 %s1038_s25, 4  ;;  %s919_s14 = int_to_ptr.vmem [resolvable:$false] %s918_s14 }
  0x85   : > { %s920_s21 = scalar_lea.vmem %s919_s14, 1024  ;;  %p921_p7 = scmp.lt.s32.totalorder %s1246_s26, %s919_s14 }
  0x86   : > { %p916_p6 = pnand %p915_p5, %p1120_p9  ;;  %p922_p1 = scmp.lt.s32.totalorder %s920_s21, %s914_s6 }
  0x88   : > { %p917_p4 = pneg %p916_p6  ;;  %p923_p10 = por %p922_p1, %p921_p7 }
  0x8a   : > { %p924_p13 = pnand %p923_p10, %p917_p4 }
  0x8c   : > { %927 = shalt.err (!%p924_p13)
}
  0x8d   : > { %s928_s24 = scalar_lea.hbm %s1236_s29, 512  ;;  %s932_s8 = scalar_lea.hbm %s1364_s4, 1024 }
  0x8e   : > { %p929_p3 = scmp.ne.s32.totalorder %s1236_s29, %s928_s24  ;;  %p933_p2 = scmp.lt.s32.totalorder %s1236_s29, %s1364_s4 }
  0x8f   : > { %p934_p5 = scmp.lt.s32.totalorder %s932_s8, %s928_s24 }
  0x90   : > { %p930_p8 = pnand %p929_p3, %p1120_p9 }
  0x91   : > { %p935_p6 = por %p934_p5, %p933_p2 }
  0x92   : > { %p931_p0 = pneg %p930_p8 }
  0x94   : > { %p936_p4 = pnand %p935_p6, %p931_p0 }
  0x96   : > { %939 = shalt.err (!%p936_p4)
}
  0x97   : > { %746 = dma.vmem_to_hbm [thread:$0]  (%p1120_p9), %s1246_s26, 512, %s1236_s29, %s1257_s13, %s1036_s0, %s1036_s0, %s1037_s27  }
  0x98   : > { %s439_s7 = scalar_lea.sflag [#allocation4], %s1179_s22  ;;  %s940_s5 = scalar_lea.vmem %s1253_s18, 512 }
  0x99   : > { %p941_p7 = scmp.ne.s32.totalorder %s1253_s18, %s940_s5  ;;  %s1039_s6 = smov [#allocation7]  }
  0x9a   : > { %s944_s25 = sshll.u32 %s1039_s6, 4  ;;  %s945_s25 = int_to_ptr.vmem [resolvable:$false] %s944_s25 }
  0x9b   : > { %p942_p1 = pnand %p941_p7, %p1120_p9  ;;  %s946_s14 = scalar_lea.vmem %s945_s25, 1024 }
  0x9c   : > { %p947_p13 = scmp.lt.s32.totalorder %s1253_s18, %s945_s25  ;;  %p948_p3 = scmp.lt.s32.totalorder %s946_s14, %s940_s5 }
  0x9d   : > { %p943_p10 = pneg %p942_p1 }
  0x9e   : > { %p949_p8 = por %p948_p3, %p947_p13 }
  0xa0   : > { %p950_p0 = pnand %p949_p8, %p943_p10 }
  0xa2   : > { %953 = shalt.err (!%p950_p0)
}
  0xa3   : > { %s954_s26 = scalar_lea.hbm %s1251_s23, 512  ;;  %s958_s13 = scalar_lea.hbm %s1362_s2, 1024 }
  0xa4   : > { %p955_p2 = scmp.ne.s32.totalorder %s1251_s23, %s954_s26  ;;  %p959_p4 = scmp.lt.s32.totalorder %s1251_s23, %s1362_s2 }
  0xa5   : > { %p960_p7 = scmp.lt.s32.totalorder %s958_s13, %s954_s26 }
  0xa6   : > { %p956_p5 = pnand %p955_p2, %p1120_p9 }
  0xa7   : > { %p961_p1 = por %p960_p7, %p959_p4 }
  0xa8   : > { %p957_p6 = pneg %p956_p5 }
  0xaa   : > { %p962_p10 = pnand %p961_p1, %p957_p6 }
  0xac   : > { %965 = shalt.err (!%p962_p10)
}
  0xad   : > { %744 = dma.vmem_to_hbm [thread:$0]  (%p1120_p9), %s1253_s18, 512, %s1251_s23, %s439_s7, %s1036_s0, %s1036_s0, %s1037_s27  }
  0xae PF: > { %s515_s10 = sand.u32 1, %s1008_s15   ;;  %p758_p13 = pnand %p688_p12, %p1129_p11 }
  0xaf   : > { %s516_s12 = scalar_lea.sflag [#allocation4], %s515_s10 }
  0xb0   : > { %p759_p3 = pneg %p758_p13 }
  0xb2   : > { %999 = dma.done.wait (%p759_p3), %s516_s12, 512  }
  0xb3   : > { %1001 = vsyncadd (%p759_p3), %s516_s12, 4294966784  ;;  %s1377_s28 = sadd.s32 4294967294, %s1028_s20  }
  0xb4   : > { %s524_s8 = sand.u32 1, %s1377_s28  }
  0xb5   : > { %s525_s9 = scalar_lea.sflag [#allocation9], %s524_s8 }
  0xb6   : > { %1003 = dma.done.wait (%p759_p3), %s525_s9, 1024  }
  0xb7   : > { %1005 = vsyncadd (%p759_p3), %s525_s9, 4294966272  ;;  %s27_s20 = sadd.s32 1, %s1028_s20   ;;  %s1378_s18 = sld [smem:[#allocation16_spill]] }
  0xb8   : > { %p24_p9 = scmp.ge.s32.totalorder %s27_s20, 4   ;;  %s1379_s30 = sld [smem:[#allocation15_spill]] }
  0xb9   : > { %s1380_s15 = smov %s1012_s16  ;;  %s1381_s16 = smov %s1016_s17 }
  0xba   :  { %26 = sbr.rel (!%p24_p9) target bundleno = 12 (0xc), region = 134 }
  0xbd   : > { %s1382_s17 = smov %s1378_s18  ;;  %s1383_s18 = smov %s1024_s19 }
  0xbe   : > { %s1384_s19 = smov %s1379_s30 }
  0xbf   :  { %539 = vsyncpa [#allocation3], 1 }
  0xc0   :  { %541 = vsyncpa [#allocation3 + $0x1], 1 }
  0xc1   :  { %542 = vsyncpa [#allocation6], 1 }
  0xc2   :  { %544 = vsyncpa [#allocation6 + $0x1], 1 }
  0xc3   :  { %545 = vsyncpa [#allocation4], 1 }
  0xc4   :  { %547 = vsyncpa [#allocation4 + $0x1], 1 }
  0xc5   :  { %548 = vsyncpa [#allocation9], 1 }
  0xc6   :  { %550 = vsyncpa [#allocation9 + $0x1], 1 }

</bundles_post_ra>
